<compile_context>
chip_gen: v5e
topology: v5e:2x2
jax: 0.10.0
libtpu: 0.0.40
codegen_flags: <defaults>
</compile_context>

<pallas_src>
import functools

import jax
import jax.numpy as jnp
from jax.experimental import pallas as pl
from jax.experimental.pallas import tpu as pltpu

EPS = 1e-5


def _round_up(a, m):
    return (a + m - 1) // m * m


def _resnet_block_kernel(x_ref, w1_ref, b1_ref, w2_ref, b2_ref,
                         segt_ref, first_ref, last_ref, o_ref, hs_ref,
                         *, cp, inv_l, mm_dtype):
    tp = x_ref.shape[-1]
    # Lane-position boundary masks arrive as (1, Tp); broadcast once (hoisted, reused by both convs).
    is_first = jnp.broadcast_to(first_ref[...], (cp, tp)) != 0.0
    is_last = jnp.broadcast_to(last_ref[...], (cp, tp)) != 0.0
    segt = segt_ref[...]                           # (Nb, Tp) 0/1 instance indicator (mm_dtype)

    def conv_norm(h, w_ref, b_ref):
        # Reflect-padded 3-tap conv: shifted operands via XLU rolls + per-instance boundary fix-up.
        rr = pltpu.roll(h, 1, 1)                   # h[l-1] (wraps at block edge, fixed below)
        rl = pltpu.roll(h, tp - 1, 1)              # h[l+1] (wraps at block edge, fixed below)
        h_prev = jnp.where(is_first, rl, rr)       # reflect: h[1]   at the first lane of an instance
        h_next = jnp.where(is_last, rr, rl)        # reflect: h[L-2] at the last lane of an instance
        # Stack the 3 taps into the shared VMEM scratch and run the conv as ONE MXU matmul.
        hs_ref[pl.ds(0, cp), :] = h_prev.astype(mm_dtype)
        hs_ref[pl.ds(cp, cp), :] = h.astype(mm_dtype)
        hs_ref[pl.ds(2 * cp, cp), :] = h_next.astype(mm_dtype)
        y = jnp.dot(w_ref[...], hs_ref[...], preferred_element_type=jnp.float32)   # (Cp, Tp)
        y = y + b_ref[...]                          # (Cp, 1) bias broadcast along lanes

        # One-pass instance-norm stats, fused: [y ; y*y] contracted against segt's lane
        # axis (trans-B) -> a single reduction matmul producing sums and sums-of-squares.
        ys = jnp.concatenate([y, y * y], axis=0).astype(mm_dtype)                  # (2Cp, Tp)
        stats = jax.lax.dot_general(ys, segt, (((1,), (1,)), ((), ())),
                                    preferred_element_type=jnp.float32)            # (2Cp, Nb)
        mean = stats[:cp] * inv_l
        var = jnp.maximum(stats[cp:] * inv_l - mean * mean, 0.0)
        # TODO(synk): one-pass variance can cancel for large-mean activations; switch to a
        #             centered two-pass update if production activations are far from zero-mean.
        rstd = jax.lax.rsqrt(var + EPS)                                             # EUP
        # Fused broadcast-back: ONE (2Cp, Nb) @ (Nb, Tp) dot yields per-lane scale & shift.
        coef = jnp.concatenate([rstd, mean * rstd], axis=0).astype(mm_dtype)        # (2Cp, Nb)
        ss = jnp.dot(coef, segt, preferred_element_type=jnp.float32)                # (2Cp, Tp)
        return y * ss[:cp] - ss[cp:]

    h = jnp.maximum(conv_norm(x_ref[0], w1_ref, b1_ref), 0.0)       # ReLU
    # TODO(synk): dropout path (use_dropout=True) omitted -- module configured with use_dropout=False.
    h = conv_norm(h, w2_ref, b2_ref)
    o_ref[0] = (x_ref[0] + h).astype(o_ref.dtype)                   # skip connection


def resnet_block(x, w1, b1, w2, b2, *, use_bf16_matmul=True,
                 block_bytes_cap=2 << 20, vmem_limit_bytes=48 << 20,
                 out_dtype=jnp.float32):
    """x: (N, C, L) f32; w*: (C, C, 3) PyTorch Conv1d layout; b*: (C,)."""
    N, C, L = x.shape
    if L < 2:
        raise ValueError("ReflectionPad1d(1) requires L >= 2 (PyTorch errors as well).")

    mm_dtype = jnp.bfloat16 if use_bf16_matmul else jnp.float32
    mm_bytes = 2 if use_bf16_matmul else 4
    Cp = _round_up(C, 16 if use_bf16_matmul else 8)        # sublane / bf16-packing alignment

    # Batch-group size Nb (ragged last group allowed; zero-padded instances normalize to
    # zero and are sliced off). Keep G >= 2 whenever N >= 2 (v7x dual TensorCore + DMA overlap).
    lane_cap = max(128, block_bytes_cap // (Cp * 4))
    nb_cap = max(1, lane_cap // L)
    if N >= 2:
        nb_cap = min(nb_cap, -(-N // 2))
    Nb = max(1, min(N, nb_cap))
    while Nb > 1 and _round_up(Nb * L, 128) * Cp * 4 > block_bytes_cap:
        Nb -= 1
    G = -(-N // Nb)
    Npad = G * Nb
    T = Nb * L
    Tp = _round_up(T, 128)                                 # lane-dense folded length

    # VMEM feasibility: block double-buffers + scratch + in-kernel live set + residents.
    blk = Cp * Tp * 4
    vmem_est = (4 * blk                          # double-buffered in + out blocks
                + 3 * Cp * Tp * mm_bytes         # shared hstack scratch
                + 8 * blk                        # f32 intermediates (rough upper bound)
                + (Nb * mm_bytes + 2 * 4) * Tp   # segt + first/last masks
                + 2 * Cp * 3 * Cp * mm_bytes + 2 * Cp * 4)
    if vmem_est > vmem_limit_bytes:
        # TODO(synk): add an L-tiling (two-pass stats) path for single instances that exceed
        #             the per-block VMEM budget (very long L, esp. on v7x's 64 MiB VMEM).
        raise ValueError(f"ResnetBlock kernel: estimated VMEM {vmem_est} B exceeds "
                         f"vmem_limit_bytes={vmem_limit_bytes}; reduce L or raise the limit.")

    # Fold batch into lanes: (N, C, L) -> (G, Cp, Tp). Skip the transposes when Nb == 1.
    xf = x.astype(jnp.float32)
    if Npad != N:
        xf = jnp.pad(xf, ((0, Npad - N), (0, 0), (0, 0)))
    if Nb == 1:
        xf = xf.reshape(G, C, T)
    else:
        xf = xf.reshape(G, Nb, C, L).transpose(0, 2, 1, 3).reshape(G, C, T)
    xf = jnp.pad(xf, ((0, 0), (0, Cp - C), (0, Tp - T)))

    # Stack the 3 taps along the contraction dim: (Cp, 3Cp); cast MXU operands.
    def stack_w(w):
        wp = jnp.pad(w.astype(jnp.float32), ((0, Cp - C), (0, Cp - C), (0, 0)))
        return jnp.concatenate([wp[:, :, 0], wp[:, :, 1], wp[:, :, 2]], axis=1).astype(mm_dtype)

    w1s, w2s = stack_w(w1), stack_w(w2)
    b1p = jnp.pad(b1.astype(jnp.float32), (0, Cp - C)).reshape(Cp, 1)
    b2p = jnp.pad(b2.astype(jnp.float32), (0, Cp - C)).reshape(Cp, 1)

    # Transposed instance indicator (Nb, Tp): 0/1 so the mm_dtype cast is lossless.
    # Boundary masks only depend on lane position -> (1, Tp) residents.
    pos = jnp.arange(Tp)
    segt = ((pos[None, :] // L == jnp.arange(Nb)[:, None]) & (pos[None, :] < T)).astype(mm_dtype)
    first_mask = (((pos % L) == 0) & (pos < T)).astype(jnp.float32)[None, :]
    last_mask = (((pos % L) == (L - 1)) & (pos < T)).astype(jnp.float32)[None, :]

    def resident(shape):                                    # constant-index (resident) block
        return pl.BlockSpec(shape, lambda g: (0,) * len(shape))

    flops_per_block = (2 * 2 * Cp * (3 * Cp) * Tp           # two fused 3-tap convs
                       + 2 * 2 * (2 * Cp) * Tp * Nb         # fused sum / sumsq reductions
                       + 2 * 2 * (2 * Cp) * Nb * Tp)        # fused scale / shift broadcasts
    cost = pl.CostEstimate(
        flops=int(G * flops_per_block),
        transcendentals=int(G * 2 * Cp * Nb),
        bytes_accessed=int(2 * G * Cp * Tp * 4
                           + 2 * Cp * 3 * Cp * mm_bytes + 2 * Cp * 4
                           + (Nb * mm_bytes + 2 * 4) * Tp),
    )

    kernel = functools.partial(_resnet_block_kernel, cp=Cp, inv_l=1.0 / L, mm_dtype=mm_dtype)

    out = pl.pallas_call(
        kernel,
        out_shape=jax.ShapeDtypeStruct((G, Cp, Tp), out_dtype),
        grid_spec=pltpu.PrefetchScalarGridSpec(
            num_scalar_prefetch=0,
            grid=(G,),
            in_specs=[
                pl.BlockSpec((1, Cp, Tp), lambda g: (g, 0, 0)),     # x: Nb instances per grid step
                resident((Cp, 3 * Cp)),                             # W1 (taps fused on K)
                resident((Cp, 1)),                                  # b1
                resident((Cp, 3 * Cp)),                             # W2
                resident((Cp, 1)),                                  # b2
                resident((Nb, Tp)),                                 # instance indicator^T
                resident((1, Tp)),                                  # first-lane-of-instance mask
                resident((1, Tp)),                                  # last-lane-of-instance mask
            ],
            out_specs=pl.BlockSpec((1, Cp, Tp), lambda g: (g, 0, 0)),
            scratch_shapes=[pltpu.VMEM((3 * Cp, Tp), mm_dtype)],    # shared hstack buffer
        ),
        compiler_params=pltpu.CompilerParams(
            dimension_semantics=("parallel",),                      # batch groups split across TCs
            vmem_limit_bytes=int(vmem_limit_bytes),
        ),
        cost_estimate=cost,
    )(xf, w1s, b1p, w2s, b2p, segt, first_mask, last_mask)

    # Un-fold back to (N, C, L).
    out = out[:, :C, :T]
    if Nb == 1:
        return out.reshape(G, C, L)[:N]
    return out.reshape(G, C, Nb, L).transpose(0, 2, 1, 3).reshape(Npad, C, L)[:N]


def _reference(x, w1, b1, w2, b2):
    """Pure-JAX reference of the same forward (for a sanity check)."""
    def conv(h, w, b):
        hp = jnp.concatenate([h[:, :, 1:2], h, h[:, :, -2:-1]], axis=2)   # reflect pad 1
        out = jnp.zeros_like(h)
        L = h.shape[2]
        for k in range(3):
            out = out + jnp.einsum('oc,ncl->nol', w[:, :, k], hp[:, :, k:k + L],
                                   precision='highest')
        return out + b[None, :, None]

    def inorm(y):
        m = jnp.mean(y, axis=2, keepdims=True)
        v = jnp.mean((y - m) ** 2, axis=2, keepdims=True)
        return (y - m) / jnp.sqrt(v + EPS)

    h = jnp.maximum(inorm(conv(x, w1, b1)), 0.0)
    h = inorm(conv(h, w2, b2))
    return x + h


if __name__ == "__main__":
    N, C, L = 2, 4, 16   # batch, dim (channels), sequence length
    key = jax.random.PRNGKey(0)
    kx, kw1, kb1, kw2, kb2 = jax.random.split(key, 5)

    x = jax.random.normal(kx, (N, C, L), dtype=jnp.float32)
    # deterministic synthetic Conv1d parameters (PyTorch layout: (C_out, C_in, 3))
    w1 = jax.random.normal(kw1, (C, C, 3), dtype=jnp.float32) * 0.2
    b1 = jax.random.normal(kb1, (C,), dtype=jnp.float32) * 0.1
    w2 = jax.random.normal(kw2, (C, C, 3), dtype=jnp.float32) * 0.2
    b2 = jax.random.normal(kb2, (C,), dtype=jnp.float32) * 0.1

    ref = _reference(x, w1, b1, w2, b2)

    # f32 MXU path: tight check against the pure-JAX reference.
    out_f32 = resnet_block(x, w1, b1, w2, b2, use_bf16_matmul=False)
    jax.block_until_ready(out_f32)
    assert out_f32.shape == (N, C, L)
    assert jnp.allclose(out_f32, ref, atol=5e-4, rtol=5e-4), "f32 kernel mismatch vs reference"

    # bf16-operand MXU path (default, for v5e/v6e/v7x throughput): loose sanity check.
    out_bf16 = resnet_block(x, w1, b1, w2, b2)
    jax.block_until_ready(out_bf16)
    assert out_bf16.shape == (N, C, L)
    assert bool(jnp.all(jnp.isfinite(out_bf16)))
    assert jnp.allclose(out_bf16, ref, atol=1e-1, rtol=1e-1), "bf16 kernel mismatch vs reference"

    print("KERNEL_OK")
</pallas_src>

<mosaic_0001>
module attributes {stable_mosaic.version = 11 : i64} {
  func.func @_resnet_block_kernel(%arg0: i32, %arg1: memref<1x8x128xf32, #tpu.memory_space<vmem>>, %arg2: memref<8x24xf32, #tpu.memory_space<vmem>>, %arg3: memref<8x1xf32, #tpu.memory_space<vmem>>, %arg4: memref<8x24xf32, #tpu.memory_space<vmem>>, %arg5: memref<8x1xf32, #tpu.memory_space<vmem>>, %arg6: memref<1x128xf32, #tpu.memory_space<vmem>>, %arg7: memref<1x128xf32, #tpu.memory_space<vmem>>, %arg8: memref<1x128xf32, #tpu.memory_space<vmem>>, %arg9: memref<1x8x128xf32, #tpu.memory_space<vmem>>, %arg10: memref<24x128xf32, #tpu.memory_space<vmem>>) attributes {dimension_semantics = [#tpu.dimension_semantics<parallel>], iteration_bounds = array<i64: 2>, scalar_prefetch = 0 : i64, scratch_operands = 1 : i64, tpu.core_type = #tpu.core_type<tc>, window_params = [{transform_indices = @transform_0, window_bounds = array<i64: 1, 8, 128>}, {pipeline_mode = #tpu.pipeline_mode<synchronous>, transform_indices = @transform_1, window_bounds = array<i64: 8, 24>}, {pipeline_mode = #tpu.pipeline_mode<synchronous>, transform_indices = @transform_2, window_bounds = array<i64: 8, 1>}, {pipeline_mode = #tpu.pipeline_mode<synchronous>, transform_indices = @transform_3, window_bounds = array<i64: 8, 24>}, {pipeline_mode = #tpu.pipeline_mode<synchronous>, transform_indices = @transform_4, window_bounds = array<i64: 8, 1>}, {pipeline_mode = #tpu.pipeline_mode<synchronous>, transform_indices = @transform_5, window_bounds = array<i64: 1, 128>}, {pipeline_mode = #tpu.pipeline_mode<synchronous>, transform_indices = @transform_6, window_bounds = array<i64: 1, 128>}, {pipeline_mode = #tpu.pipeline_mode<synchronous>, transform_indices = @transform_7, window_bounds = array<i64: 1, 128>}, {transform_indices = @transform_8, window_bounds = array<i64: 1, 8, 128>}]} {
    %c0 = arith.constant 0 : index
    %c0_0 = arith.constant 0 : index
    %0 = vector.load %arg7[%c0, %c0_0] : memref<1x128xf32, #tpu.memory_space<vmem>>, vector<1x128xf32>
    %1 = vector.shape_cast %0 : vector<1x128xf32> to vector<1x128xf32>
    %2 = vector.broadcast %1 : vector<1x128xf32> to vector<8x128xf32>
    %cst = arith.constant 0.000000e+00 : f32
    %3 = vector.broadcast %cst : f32 to vector<8x128xf32>
    %4 = arith.cmpf one, %2, %3 : vector<8x128xf32>
    %c0_1 = arith.constant 0 : index
    %c0_2 = arith.constant 0 : index
    %5 = vector.load %arg8[%c0_1, %c0_2] : memref<1x128xf32, #tpu.memory_space<vmem>>, vector<1x128xf32>
    %6 = vector.shape_cast %5 : vector<1x128xf32> to vector<1x128xf32>
    %7 = vector.broadcast %6 : vector<1x128xf32> to vector<8x128xf32>
    %cst_3 = arith.constant 0.000000e+00 : f32
    %8 = vector.broadcast %cst_3 : f32 to vector<8x128xf32>
    %9 = arith.cmpf one, %7, %8 : vector<8x128xf32>
    %c0_4 = arith.constant 0 : index
    %c0_5 = arith.constant 0 : index
    %10 = vector.load %arg6[%c0_4, %c0_5] : memref<1x128xf32, #tpu.memory_space<vmem>>, vector<1x128xf32>
    %c0_6 = arith.constant 0 : index
    %c0_7 = arith.constant 0 : index
    %c0_8 = arith.constant 0 : index
    %11 = vector.load %arg1[%c0_6, %c0_7, %c0_8] : memref<1x8x128xf32, #tpu.memory_space<vmem>>, vector<1x8x128xf32>
    %12 = vector.shape_cast %11 : vector<1x8x128xf32> to vector<8x128xf32>
    %c1_i32 = arith.constant 1 : i32
    %13 = tpu.dynamic_rotate %12 by %c1_i32 dim 1 : vector<8x128xf32>, i32 -> vector<8x128xf32>
    %c127_i32 = arith.constant 127 : i32
    %14 = tpu.dynamic_rotate %12 by %c127_i32 dim 1 : vector<8x128xf32>, i32 -> vector<8x128xf32>
    %15 = arith.select %4, %14, %13 : vector<8x128xi1>, vector<8x128xf32>
    %16 = arith.select %9, %13, %14 : vector<8x128xi1>, vector<8x128xf32>
    %c0_9 = arith.constant 0 : index
    %c0_10 = arith.constant 0 : index
    %17 = vector.load %arg10[%c0_9, %c0_10] : memref<24x128xf32, #tpu.memory_space<vmem>>, vector<8x128xf32>
    tpu.vector_store %arg10[%c0_9, %c0_10], %15 {strides = array<i32>} : memref<24x128xf32, #tpu.memory_space<vmem>>, vector<8x128xf32>,
    %c8 = arith.constant 8 : index
    %c0_11 = arith.constant 0 : index
    %18 = vector.load %arg10[%c8, %c0_11] : memref<24x128xf32, #tpu.memory_space<vmem>>, vector<8x128xf32>
    tpu.vector_store %arg10[%c8, %c0_11], %12 {strides = array<i32>} : memref<24x128xf32, #tpu.memory_space<vmem>>, vector<8x128xf32>,
    %c16 = arith.constant 16 : index
    %c0_12 = arith.constant 0 : index
    %19 = vector.load %arg10[%c16, %c0_12] : memref<24x128xf32, #tpu.memory_space<vmem>>, vector<8x128xf32>
    tpu.vector_store %arg10[%c16, %c0_12], %16 {strides = array<i32>} : memref<24x128xf32, #tpu.memory_space<vmem>>, vector<8x128xf32>,
    %c0_13 = arith.constant 0 : index
    %c0_14 = arith.constant 0 : index
    %20 = vector.load %arg2[%c0_13, %c0_14] : memref<8x24xf32, #tpu.memory_space<vmem>>, vector<8x24xf32>
    %c0_15 = arith.constant 0 : index
    %c0_16 = arith.constant 0 : index
    %21 = vector.load %arg10[%c0_15, %c0_16] : memref<24x128xf32, #tpu.memory_space<vmem>>, vector<24x128xf32>
    %cst_17 = arith.constant dense<0.000000e+00> : vector<8x128xf32>
    %22 = tpu.matmul %20, %21, %cst_17 {dimension_numbers = #tpu.dot_dimension_numbers<[1], [0], [0], [1], [0, 0, 1, 1], [], []>} : vector<8x24xf32>, vector<24x128xf32>, vector<8x128xf32> -> vector<8x128xf32>
    %c0_18 = arith.constant 0 : index
    %c0_19 = arith.constant 0 : index
    %23 = vector.load %arg3[%c0_18, %c0_19] : memref<8x1xf32, #tpu.memory_space<vmem>>, vector<8x1xf32>
    %24 = vector.broadcast %23 : vector<8x1xf32> to vector<8x128xf32>
    %25 = arith.addf %22, %24 : vector<8x128xf32>
    %26 = arith.mulf %25, %25 : vector<8x128xf32>
    %27 = tpu.concatenate %25, %26 in 0 : vector<8x128xf32>, vector<8x128xf32> -> vector<16x128xf32>
    %cst_20 = arith.constant dense<0.000000e+00> : vector<16x1xf32>
    %28 = tpu.matmul %27, %10, %cst_20 {dimension_numbers = #tpu.dot_dimension_numbers<[1], [1], [0], [0], [0, 0, 1, 0], [], []>} : vector<16x128xf32>, vector<1x128xf32>, vector<16x1xf32> -> vector<16x1xf32>
    %29 = vector.extract_strided_slice %28 {offsets = [0, 0], sizes = [8, 1], strides = [1, 1]} : vector<16x1xf32> to vector<8x1xf32>
    %cst_21 = arith.constant 6.250000e-02 : f32
    %30 = vector.broadcast %cst_21 : f32 to vector<8x1xf32>
    %31 = arith.mulf %29, %30 : vector<8x1xf32>
    %32 = vector.extract_strided_slice %28 {offsets = [8, 0], sizes = [8, 1], strides = [1, 1]} : vector<16x1xf32> to vector<8x1xf32>
    %cst_22 = arith.constant 6.250000e-02 : f32
    %33 = vector.broadcast %cst_22 : f32 to vector<8x1xf32>
    %34 = arith.mulf %32, %33 : vector<8x1xf32>
    %35 = arith.mulf %31, %31 : vector<8x1xf32>
    %36 = arith.subf %34, %35 : vector<8x1xf32>
    %cst_23 = arith.constant 0.000000e+00 : f32
    %37 = vector.broadcast %cst_23 : f32 to vector<8x1xf32>
    %38 = arith.maximumf %36, %37 : vector<8x1xf32>
    %cst_24 = arith.constant 9.99999974E-6 : f32
    %39 = vector.broadcast %cst_24 : f32 to vector<8x1xf32>
    %40 = arith.addf %38, %39 : vector<8x1xf32>
    %41 = math.rsqrt %40 : vector<8x1xf32>
    %42 = arith.mulf %31, %41 : vector<8x1xf32>
    %43 = tpu.concatenate %41, %42 in 0 : vector<8x1xf32>, vector<8x1xf32> -> vector<16x1xf32>
    %cst_25 = arith.constant dense<0.000000e+00> : vector<16x128xf32>
    %44 = tpu.matmul %43, %10, %cst_25 {dimension_numbers = #tpu.dot_dimension_numbers<[1], [0], [0], [1], [0, 0, 1, 1], [], []>} : vector<16x1xf32>, vector<1x128xf32>, vector<16x128xf32> -> vector<16x128xf32>
    %45 = vector.extract_strided_slice %44 {offsets = [0, 0], sizes = [8, 128], strides = [1, 1]} : vector<16x128xf32> to vector<8x128xf32>
    %46 = arith.mulf %25, %45 : vector<8x128xf32>
    %47 = vector.extract_strided_slice %44 {offsets = [8, 0], sizes = [8, 128], strides = [1, 1]} : vector<16x128xf32> to vector<8x128xf32>
    %48 = arith.subf %46, %47 : vector<8x128xf32>
    %cst_26 = arith.constant 0.000000e+00 : f32
    %49 = vector.broadcast %cst_26 : f32 to vector<8x128xf32>
    %50 = arith.maximumf %48, %49 : vector<8x128xf32>
    %c1_i32_27 = arith.constant 1 : i32
    %51 = tpu.dynamic_rotate %50 by %c1_i32_27 dim 1 : vector<8x128xf32>, i32 -> vector<8x128xf32>
    %c127_i32_28 = arith.constant 127 : i32
    %52 = tpu.dynamic_rotate %50 by %c127_i32_28 dim 1 : vector<8x128xf32>, i32 -> vector<8x128xf32>
    %53 = arith.select %4, %52, %51 : vector<8x128xi1>, vector<8x128xf32>
    %54 = arith.select %9, %51, %52 : vector<8x128xi1>, vector<8x128xf32>
    %c0_29 = arith.constant 0 : index
    %c0_30 = arith.constant 0 : index
    %55 = vector.load %arg10[%c0_29, %c0_30] : memref<24x128xf32, #tpu.memory_space<vmem>>, vector<8x128xf32>
    tpu.vector_store %arg10[%c0_29, %c0_30], %53 {strides = array<i32>} : memref<24x128xf32, #tpu.memory_space<vmem>>, vector<8x128xf32>,
    %c8_31 = arith.constant 8 : index
    %c0_32 = arith.constant 0 : index
    %56 = vector.load %arg10[%c8_31, %c0_32] : memref<24x128xf32, #tpu.memory_space<vmem>>, vector<8x128xf32>
    tpu.vector_store %arg10[%c8_31, %c0_32], %50 {strides = array<i32>} : memref<24x128xf32, #tpu.memory_space<vmem>>, vector<8x128xf32>,
    %c16_33 = arith.constant 16 : index
    %c0_34 = arith.constant 0 : index
    %57 = vector.load %arg10[%c16_33, %c0_34] : memref<24x128xf32, #tpu.memory_space<vmem>>, vector<8x128xf32>
    tpu.vector_store %arg10[%c16_33, %c0_34], %54 {strides = array<i32>} : memref<24x128xf32, #tpu.memory_space<vmem>>, vector<8x128xf32>,
    %c0_35 = arith.constant 0 : index
    %c0_36 = arith.constant 0 : index
    %58 = vector.load %arg4[%c0_35, %c0_36] : memref<8x24xf32, #tpu.memory_space<vmem>>, vector<8x24xf32>
    %c0_37 = arith.constant 0 : index
    %c0_38 = arith.constant 0 : index
    %59 = vector.load %arg10[%c0_37, %c0_38] : memref<24x128xf32, #tpu.memory_space<vmem>>, vector<24x128xf32>
    %cst_39 = arith.constant dense<0.000000e+00> : vector<8x128xf32>
    %60 = tpu.matmul %58, %59, %cst_39 {dimension_numbers = #tpu.dot_dimension_numbers<[1], [0], [0], [1], [0, 0, 1, 1], [], []>} : vector<8x24xf32>, vector<24x128xf32>, vector<8x128xf32> -> vector<8x128xf32>
    %c0_40 = arith.constant 0 : index
    %c0_41 = arith.constant 0 : index
    %61 = vector.load %arg5[%c0_40, %c0_41] : memref<8x1xf32, #tpu.memory_space<vmem>>, vector<8x1xf32>
    %62 = vector.broadcast %61 : vector<8x1xf32> to vector<8x128xf32>
    %63 = arith.addf %60, %62 : vector<8x128xf32>
    %64 = arith.mulf %63, %63 : vector<8x128xf32>
    %65 = tpu.concatenate %63, %64 in 0 : vector<8x128xf32>, vector<8x128xf32> -> vector<16x128xf32>
    %cst_42 = arith.constant dense<0.000000e+00> : vector<16x1xf32>
    %66 = tpu.matmul %65, %10, %cst_42 {dimension_numbers = #tpu.dot_dimension_numbers<[1], [1], [0], [0], [0, 0, 1, 0], [], []>} : vector<16x128xf32>, vector<1x128xf32>, vector<16x1xf32> -> vector<16x1xf32>
    %67 = vector.extract_strided_slice %66 {offsets = [0, 0], sizes = [8, 1], strides = [1, 1]} : vector<16x1xf32> to vector<8x1xf32>
    %cst_43 = arith.constant 6.250000e-02 : f32
    %68 = vector.broadcast %cst_43 : f32 to vector<8x1xf32>
    %69 = arith.mulf %67, %68 : vector<8x1xf32>
    %70 = vector.extract_strided_slice %66 {offsets = [8, 0], sizes = [8, 1], strides = [1, 1]} : vector<16x1xf32> to vector<8x1xf32>
    %cst_44 = arith.constant 6.250000e-02 : f32
    %71 = vector.broadcast %cst_44 : f32 to vector<8x1xf32>
    %72 = arith.mulf %70, %71 : vector<8x1xf32>
    %73 = arith.mulf %69, %69 : vector<8x1xf32>
    %74 = arith.subf %72, %73 : vector<8x1xf32>
    %cst_45 = arith.constant 0.000000e+00 : f32
    %75 = vector.broadcast %cst_45 : f32 to vector<8x1xf32>
    %76 = arith.maximumf %74, %75 : vector<8x1xf32>
    %cst_46 = arith.constant 9.99999974E-6 : f32
    %77 = vector.broadcast %cst_46 : f32 to vector<8x1xf32>
    %78 = arith.addf %76, %77 : vector<8x1xf32>
    %79 = math.rsqrt %78 : vector<8x1xf32>
    %80 = arith.mulf %69, %79 : vector<8x1xf32>
    %81 = tpu.concatenate %79, %80 in 0 : vector<8x1xf32>, vector<8x1xf32> -> vector<16x1xf32>
    %cst_47 = arith.constant dense<0.000000e+00> : vector<16x128xf32>
    %82 = tpu.matmul %81, %10, %cst_47 {dimension_numbers = #tpu.dot_dimension_numbers<[1], [0], [0], [1], [0, 0, 1, 1], [], []>} : vector<16x1xf32>, vector<1x128xf32>, vector<16x128xf32> -> vector<16x128xf32>
    %83 = vector.extract_strided_slice %82 {offsets = [0, 0], sizes = [8, 128], strides = [1, 1]} : vector<16x128xf32> to vector<8x128xf32>
    %84 = arith.mulf %63, %83 : vector<8x128xf32>
    %85 = vector.extract_strided_slice %82 {offsets = [8, 0], sizes = [8, 128], strides = [1, 1]} : vector<16x128xf32> to vector<8x128xf32>
    %86 = arith.subf %84, %85 : vector<8x128xf32>
    %c0_48 = arith.constant 0 : index
    %c0_49 = arith.constant 0 : index
    %c0_50 = arith.constant 0 : index
    %87 = vector.load %arg1[%c0_48, %c0_49, %c0_50] : memref<1x8x128xf32, #tpu.memory_space<vmem>>, vector<1x8x128xf32>
    %88 = vector.shape_cast %87 : vector<1x8x128xf32> to vector<8x128xf32>
    %89 = arith.addf %88, %86 : vector<8x128xf32>
    %c0_51 = arith.constant 0 : index
    %c0_52 = arith.constant 0 : index
    %c0_53 = arith.constant 0 : index
    %90 = vector.load %arg9[%c0_51, %c0_52, %c0_53] : memref<1x8x128xf32, #tpu.memory_space<vmem>>, vector<1x8x128xf32>
    %91 = vector.shape_cast %90 : vector<1x8x128xf32> to vector<8x128xf32>
    %92 = vector.shape_cast %89 : vector<8x128xf32> to vector<1x8x128xf32>
    tpu.vector_store %arg9[%c0_51, %c0_52, %c0_53], %92 {strides = array<i32>} : memref<1x8x128xf32, #tpu.memory_space<vmem>>, vector<1x8x128xf32>,
    return
  }
  func.func @transform_0(%arg0: i32) -> (i32, i32, i32) {
    %c0_i32 = arith.constant 0 : i32
    %c0_i32_0 = arith.constant 0 : i32
    %c0_i32_1 = arith.constant 0 : i32
    return %arg0, %c0_i32, %c0_i32_0 : i32, i32, i32
  }
  func.func @transform_1(%arg0: i32) -> (i32, i32) {
    %c0_i32 = arith.constant 0 : i32
    %c0_i32_0 = arith.constant 0 : i32
    %c0_i32_1 = arith.constant 0 : i32
    return %c0_i32, %c0_i32_0 : i32, i32
  }
  func.func @transform_2(%arg0: i32) -> (i32, i32) {
    %c0_i32 = arith.constant 0 : i32
    %c0_i32_0 = arith.constant 0 : i32
    %c0_i32_1 = arith.constant 0 : i32
    return %c0_i32, %c0_i32_0 : i32, i32
  }
  func.func @transform_3(%arg0: i32) -> (i32, i32) {
    %c0_i32 = arith.constant 0 : i32
    %c0_i32_0 = arith.constant 0 : i32
    %c0_i32_1 = arith.constant 0 : i32
    return %c0_i32, %c0_i32_0 : i32, i32
  }
  func.func @transform_4(%arg0: i32) -> (i32, i32) {
    %c0_i32 = arith.constant 0 : i32
    %c0_i32_0 = arith.constant 0 : i32
    %c0_i32_1 = arith.constant 0 : i32
    return %c0_i32, %c0_i32_0 : i32, i32
  }
  func.func @transform_5(%arg0: i32) -> (i32, i32) {
    %c0_i32 = arith.constant 0 : i32
    %c0_i32_0 = arith.constant 0 : i32
    %c0_i32_1 = arith.constant 0 : i32
    return %c0_i32, %c0_i32_0 : i32, i32
  }
  func.func @transform_6(%arg0: i32) -> (i32, i32) {
    %c0_i32 = arith.constant 0 : i32
    %c0_i32_0 = arith.constant 0 : i32
    %c0_i32_1 = arith.constant 0 : i32
    return %c0_i32, %c0_i32_0 : i32, i32
  }
  func.func @transform_7(%arg0: i32) -> (i32, i32) {
    %c0_i32 = arith.constant 0 : i32
    %c0_i32_0 = arith.constant 0 : i32
    %c0_i32_1 = arith.constant 0 : i32
    return %c0_i32, %c0_i32_0 : i32, i32
  }
  func.func @transform_8(%arg0: i32) -> (i32, i32, i32) {
    %c0_i32 = arith.constant 0 : i32
    %c0_i32_0 = arith.constant 0 : i32
    %c0_i32_1 = arith.constant 0 : i32
    return %arg0, %c0_i32, %c0_i32_0 : i32, i32, i32
  }
}

</mosaic_0001>

<bundles_post_ra>
// kernel: tpu_custom_call.1
= control target key start
LH: loop header
LB: loop body
LE: loop exit
PB: predicated region body
PF: predicated region fallthrough
CT: control target
= control target key end

     0   :  { %13 = vsyncpa [#allocation4], 0  ;;  %s1075_s0 = inlined_call_operand.vmem [shape: f32[2,8,128], index: 0, kind: input, shape index: {}]   ;;  %s1076_s1 = inlined_call_operand.hbm [shape: f32[8,24], index: 1, kind: input, shape index: {}]   ;;  %s1077_s2 = inlined_call_operand.vmem [shape: f32[8,1], index: 2, kind: input, shape index: {}]   ;;  %s1078_s3 = inlined_call_operand.hbm [shape: f32[8,24], index: 3, kind: input, shape index: {}]   ;;  %s1079_s4 = inlined_call_operand.vmem [shape: f32[8,1], index: 4, kind: input, shape index: {}]   ;;  %s1080_s5 = inlined_call_operand.vmem [shape: f32[1,128], index: 5, kind: input, shape index: {}]   ;;  %s1081_s6 = inlined_call_operand.vmem [shape: f32[1,128], index: 6, kind: input, shape index: {}]   ;;  %s1082_s7 = inlined_call_operand.vmem [shape: f32[1,128], index: 7, kind: input, shape index: {}]   ;;  %s1083_s8 = inlined_call_operand.hbm [shape: f32[2,8,128], index: 8, kind: output, shape index: {}]  }
   0x1   :  { %14 = vsyncpa [#allocation7], 0 }
   0x2   :  { %15 = vsyncpa [#allocation5], 0 }
   0x3   :  { %17 = vsyncpa [#allocation5 + $0x1], 0  ;;  %s922_s27 = smov 0   ;;  %s924_s28 = smov 0  }
   0x4   :  { %s926_s29 = smov 0   ;;  %s928_s30 = smov 0  }
   0x5 LB: > { %s943_s9 = sadd.s32 4294967295, %s870_s30   ;;  %s646_s10 = sadd.s32 4294967294, %s870_s30   ;;  %s870_s30 = sphi %s928_s30, %s1090_s30   ;;  %s866_s29 = sphi %s926_s29, %s1089_s29   ;;  %s862_s28 = sphi %s924_s28, %s1088_s28   ;;  %s858_s27 = sphi %s922_s27, %s1087_s27  }
   0x6   : > { %s947_s11 = sadd.s32 1, %s870_s30   ;;  %s203_s12 = sadd.s32 1, %s866_s29 }
   0x7   : > { %s200_s13 = ssub.s32 %s870_s30, %s947_s11  ;;  %p213_p0 = scmp.ne.s32.totalorder %s866_s29, %s862_s28 }
   0x8   : > { %p201_p1 = scmp.eq.s32.totalorder %s200_s13, 0  ;;  %p214_p2 = scmp.eq.s32.totalorder %s943_s9, 1 }
   0x9   : > { %p219_p3 = scmp.ne.s32.totalorder %s862_s28, %s858_s27  ;;  %p220_p4 = scmp.eq.s32.totalorder %s646_s10, 1 }
   0xa   : > { %s958_s14 = scalar_select %p201_p1, %s866_s29, %s203_s12  }
   0xb   : > { %p960_p5 = por %p214_p2, %p213_p0  ;;  %p964_p6 = por %p220_p4, %p219_p3 }
   0xc   : > { %p647_p7 = scmp.ge.s32.totalorder %s870_s30, 1  ;;  %p227_p8 = scmp.lt.s32.totalorder %s870_s30, 3 }
   0xd   : > { %p689_p9 = scmp.eq.s32.totalorder %s943_s9, 0  ;;  %s239_s20 = sshll.u32 %s1076_s1, 4  ;;  %s240_s20 = int_to_ptr.hbm [resolvable:$true] %s239_s20 }
   0xe   : > { %p971_p10 = pnand %p647_p7, %p227_p8  ;;  %s872_s21 = smov [#allocation3]  }
   0xf   : > { %s241_s22 = sshll.u32 %s872_s21, 4  ;;  %s254_s25 = sshll.u32 %s1078_s3, 4  ;;  %s242_s22 = int_to_ptr.vmem [resolvable:$true] %s241_s22  ;;  %s255_s25 = int_to_ptr.hbm [resolvable:$true] %s254_s25 }
  0x10   : > { %p678_p11 = pneg %p971_p10  ;;  %s873_s26 = smov [#allocation6]  }
  0x11   : > { %s256_s10 = sshll.u32 %s873_s26, 4  ;;  %288 = sbr.rel (%p971_p10) target bundleno = 1121 (0x461), region = 52  ;;  %s257_s10 = int_to_ptr.vmem [resolvable:$true] %s256_s10 }
  0x12   : > { %p679_p12 = pnand %p689_p9, %p678_p11 }
  0x14   : > { %681 = dma.hbm_to_vmem [thread:$0]  (!%p679_p12), %s240_s20, 128, %s242_s22, [#allocation4]  }
  0x15   : > { %684 = dma.hbm_to_vmem [thread:$0]  (!%p679_p12), %s255_s25, 128, %s257_s10, [#allocation7]  }
  0x16   : > { %845 = dma.done.wait (%p689_p9), [#allocation4], 128  }
  0x17   : > { %847 = vsyncadd (%p689_p9), [#allocation4], 4294967168 }
  0x18   : > { %849 = dma.done.wait (%p689_p9), [#allocation7], 128  }
  0x19   : > { %851 = vsyncadd (%p689_p9), [#allocation7], 4294967168  ;;  %p327_p13 = scmp.lt.s32.totalorder %s943_s9, 1  ;;  %s874_s20 = smov 1   ;;  %v356_v1 = vld [vmem:[%s1077_s2] sm:$0xff]  ;;  %v876_v2 = vmov 0  }
  0x1a   : > { %s875_s21 = smov 127   ;;  %731 = vset.pattern.permute.xlu1 %v876_v2  ;;  %732 = vset.pattern.permute.xlu0 %v876_v2  ;;  %v733_v4 = vld [vmem:[%s1082_s7] ss:$0 sm:$0xff]  ;;  %vm362_vm2 = vcmask 195584   ;;  %vm420_vm3 = vcmask 1040384   ;;  %vm413_vm6 = vcmask 7168  }
  0x1b   : > { %s328_s12 = scalar_select %p327_p13, %s943_s9, 1  ;;  %359 = vperm.xlu1 %731, %v356_v1   ;;  %vm340_vm0 = vcmp.ne.f32.partialorder %v733_v4, 0.0  ;;  %v1015_v5 = vld [vmem:[%s1081_s6] ss:$0 sm:$0xff]  ;;  %v458_v43 = vld [vmem:[#allocation6] sm:$0xff] }
  0x1c   : > { %vm335_vm1 = vcmp.ne.f32.partialorder %v1015_v5, 0.0  ;;  %v352_v8 = vld [vmem:[#allocation3] sm:$0xff]  ;;  %s665_s23 = sshll.u32 %s943_s9, 3 }
  0x1d   : > { %s655_s13 = sshll.u32 %s328_s12, 3  ;;  %v735_v11 = vld [vmem:[%s1080_s5] ss:$0 sm:$0xff]  ;;  %s560_s26 = scalar_lea.hbm %s1083_s8, %s665_s23 }
  0x1e   : > { %s330_s19 = scalar_lea.vmem %s1075_s0, %s655_s13  ;;  %v341_v17 = vld [vmem:[%s1080_s5] sm:$0x1]  ;;  %s564_s13 = sshll.u32 %s560_s26, 4  ;;  %s565_s13 = int_to_ptr.hbm [resolvable:$true] %s564_s13 }
  0x1f   : > { %v1000_v0 = vld [vmem:[%s330_s19] sm:$0xff]  ;;  %657 = vmatpush.msk.msra.mxu1 %vm420_vm3, %v341_v17  ;;  %661 = vmatpush.msk.msra.mxu3 %vm420_vm3, %v341_v17  ;;  %s814_s17 = sshra.s32 %s565_s13, 4  ;;  %s815_s17 = int_to_ptr.hbm [resolvable:$true] %s814_s17 }
  0x20   : > { %343 = vrot.lane.b32.xlu0 %v1000_v0, %s874_s20  ;;  %v462_v39 = vld [vmem:[%s1079_s4] sm:$0xff]  ;;  %s816_s9 = scalar_lea.hbm %s815_s17, 8  ;;  %p821_p3 = scmp.lt.s32.totalorder %s815_s17, %s1083_s8 }
  0x21   : > { %p817_p0 = scmp.ne.s32.totalorder %s815_s17, %s816_s9 }
  0x23   : > { %p818_p1 = pnand %p817_p0, %p960_p5 }
  0x25   : > { %p819_p2 = pneg %p818_p1 }
  0x28   : > { %345 = vrot.lane.b32.xlu0 %v1000_v0, %s875_s21 }
  0x8d   : > { %v360_v10 = vpop.permute.xlu1 %359 }
  0x92   : > { %v344_v3 = vpop.permute.xlu0 %343 }
  0x9a   : > { %v346_v6 = vpop.permute.xlu0 %345 }
  0x9b   : > { %v348_v7 = vsel %vm340_vm0, %v344_v3, %v346_v6  ;;  %v347_v9 = vsel %vm335_vm1, %v346_v6, %v344_v3 }
  0x9c   : > { %379 = vmatpush.msra.mxu0 %v348_v7 }
  0x9e   : > { %380 = vmatpush.msra.mxu0 %v1000_v0 }
  0xa0   : > { %381 = vmatpush.msra.mxu0 %v347_v9 }
  0xa1   : > { %656 = vmatmul.msk.f32.vlgmr.msra.gmra.mxu0 %vm362_vm2, %v352_v8 }
 0x11e   : > { %v383_v12 = vpop.f32.mrf.mxu0 }
 0x11f   : > { %v384_v13 = vadd.f32 %v383_v12, %v360_v10 }
 0x121   : > { %v390_v14 = vmul.f32 %v735_v11, %v384_v13  ;;  %v386_v15 = vmul.f32 %v384_v13, %v384_v13 }
 0x123   : > { %392 = vadd.xlane.f32.xlu1 %v390_v14  ;;  %v391_v16 = vmul.f32 %v735_v11, %v386_v15 }
 0x125   : > { %394 = vadd.xlane.f32.xlu2 %v391_v16 }
 0x196   : > { %v393_v18 = vpop.xlane.xlu1 %392 }
 0x197   : > { %v396_v19 = vmul.f32 0.0625, %v393_v18 }
 0x198   : > { %v395_v20 = vpop.xlane.xlu2 %394 }
 0x199   : > { %v398_v21 = vmul.f32 %v396_v19, %v396_v19  ;;  %v397_v22 = vmul.f32 0.0625, %v395_v20 }
 0x19b   : > { %v399_v23 = vsub.f32 %v397_v22, %v398_v21 }
 0x19d   : > { %v400_v24 = vmax.f32 %v399_v23, 0.0 }
 0x19f   : > { %v401_v25 = vadd.f32 1e-05, %v400_v24 }
 0x1a1   : > { %736 = vrsqrt.f32 %v401_v25  ;;  %vm408_vm5 = vweird.f32 %v401_v25 }
 0x1a7   : > { %v737_v26 = vpop.eup %736 }
 0x1a8   : > { %v403_v27 = vmul.f32 %v737_v26, %v401_v25  ;;  %vm409_vm4 = vweird.f32 %v737_v26 }
 0x1a9   : > { %vm410_vm7 = vmor %vm408_vm5, %vm409_vm4 }
 0x1aa   : > { %v404_v28 = vmul.f32 %v737_v26, %v403_v27 }
 0x1ac   : > { %v405_v29 = vmul.f32 0.5, %v404_v28 }
 0x1ae   : > { %v406_v30 = vsub.f32 1.5, %v405_v29 }
 0x1b0   : > { %v407_v31 = vmul.f32 %v737_v26, %v406_v30 }
 0x1b2   : > { %v411_v32 = vsel %vm410_vm7, %v737_v26, %v407_v31 }
 0x1b3   : > { %658 = vmatmul.msk.f32.vlgmr.msra.gmra.mxu1 %vm413_vm6, %v411_v32  ;;  %v412_v33 = vmul.f32 %v411_v32, %v396_v19 }
 0x1bb   : > { %659 = vmatmul.msk.f32.gmra.mxu1 %vm413_vm6, %v412_v33 }
 0x230   : > { %v440_v34 = vpop.f32.mrf.mxu1 }
 0x231   : > { %v446_v35 = vmul.f32 %v440_v34, %v384_v13 }
 0x238   : > { %v443_v36 = vpop.f32.mrf.mxu1 }
 0x239   : > { %v447_v37 = vsub.f32 %v446_v35, %v443_v36 }
 0x23b   : > { %v448_v38 = vmax.f32 %v447_v37, 0.0 }
 0x23d   : > { %451 = vrot.lane.b32.xlu0 %v448_v38, %s875_s21  ;;  %449 = vrot.lane.b32.xlu2 %v448_v38, %s874_s20  ;;  %s324_s20 = sand.u32 1, %s862_s28  }
 0x23e   : > { %s654_s21 = sshll.u32 %s324_s20, 3  ;;  %s550_s18 = scalar_lea.sflag [#allocation5], %s324_s20 }
 0x23f   : > { %s326_s10 = scalar_lea.vmem [#allocation8], %s654_s21  ;;  %s820_s21 = scalar_lea.hbm %s1083_s8, 16 }
 0x240   : > { %s562_s12 = sshll.u32 %s326_s10, 4  ;;  %p822_p4 = scmp.lt.s32.totalorder %s820_s21, %s816_s9  ;;  %s563_s12 = int_to_ptr.vmem [resolvable:$true] %s562_s12 }
 0x242   : > { %p823_p7 = por %p822_p4, %p821_p3 }
 0x244   : > { %p824_p8 = pnand %p823_p7, %p819_p2 }
 0x245   : > { %465 = vperm.xlu0 %732, %v462_v39  }
 0x297   : > { %v450_v40 = vpop.permute.xlu2 %449 }
 0x2af   : > { %v452_v41 = vpop.permute.xlu0 %451 }
 0x2b0   : > { %v454_v42 = vsel %vm340_vm0, %v450_v40, %v452_v41  ;;  %v453_v44 = vsel %vm335_vm1, %v452_v41, %v450_v40 }
 0x2b1   : > { %484 = vmatpush.msra.mxu2 %v454_v42 }
 0x2b3   : > { %485 = vmatpush.msra.mxu2 %v448_v38 }
 0x2b5   : > { %486 = vmatpush.msra.mxu2 %v453_v44 }
 0x2b6   : > { %660 = vmatmul.msk.f32.vlgmr.msra.gmra.mxu2 %vm362_vm2, %v458_v43 }
 0x2b7   : > { %v466_v45 = vpop.permute.xlu0 %465 }
 0x339   : > { %v488_v46 = vpop.f32.mrf.mxu2 }
 0x33a   : > { %v489_v47 = vadd.f32 %v488_v46, %v466_v45 }
 0x33c   : > { %v492_v48 = vmul.f32 %v735_v11, %v489_v47  ;;  %v491_v49 = vmul.f32 %v489_v47, %v489_v47 }
 0x33e   : > { %494 = vadd.xlane.f32.xlu2 %v492_v48  ;;  %v493_v50 = vmul.f32 %v735_v11, %v491_v49 }
 0x340   : > { %496 = vadd.xlane.f32.xlu0 %v493_v50 }
 0x3b1   : > { %v495_v51 = vpop.xlane.xlu2 %494 }
 0x3b2   : > { %v498_v52 = vmul.f32 0.0625, %v495_v51 }
 0x3b3   : > { %v497_v53 = vpop.xlane.xlu0 %496 }
 0x3b4   : > { %v500_v54 = vmul.f32 %v498_v52, %v498_v52  ;;  %v499_v55 = vmul.f32 0.0625, %v497_v53 }
 0x3b6   : > { %v501_v56 = vsub.f32 %v499_v55, %v500_v54 }
 0x3b8   : > { %v502_v57 = vmax.f32 %v501_v56, 0.0 }
 0x3ba   : > { %v503_v58 = vadd.f32 1e-05, %v502_v57 }
 0x3bc   : > { %738 = vrsqrt.f32 %v503_v58  ;;  %vm510_vm9 = vweird.f32 %v503_v58 }
 0x3c2   : > { %v739_v59 = vpop.eup %738 }
 0x3c3   : > { %v505_v60 = vmul.f32 %v739_v59, %v503_v58  ;;  %vm511_vm8 = vweird.f32 %v739_v59 }
 0x3c4   : > { %vm512_vm10 = vmor %vm510_vm9, %vm511_vm8 }
 0x3c5   : > { %v506_v61 = vmul.f32 %v739_v59, %v505_v60 }
 0x3c7   : > { %v507_v62 = vmul.f32 0.5, %v506_v61 }
 0x3c9   : > { %v508_v63 = vsub.f32 1.5, %v507_v62 }
 0x3cb   : > { %v509_v1 = vmul.f32 %v739_v59, %v508_v63 }
 0x3cd   : > { %v513_v2 = vsel %vm512_vm10, %v739_v59, %v509_v1 }
 0x3ce   : > { %662 = vmatmul.msk.f32.vlgmr.msra.gmra.mxu3 %vm413_vm6, %v513_v2  ;;  %v514_v3 = vmul.f32 %v513_v2, %v498_v52 }
 0x3d6   : > { %663 = vmatmul.msk.f32.gmra.mxu3 %vm413_vm6, %v514_v3 }
 0x451   : > { %v538_v4 = vpop.f32.mrf.mxu3 }
 0x452   : > { %v544_v5 = vmul.f32 %v538_v4, %v489_v47 }
 0x459   : > { %v541_v6 = vpop.f32.mrf.mxu3 }
 0x45a   : > { %v545_v7 = vsub.f32 %v544_v5, %v541_v6 }
 0x45c   : > { %v547_v8 = vadd.f32 %v545_v7, %v1000_v0 }
 0x45e   : > { %548 = vst [vmem:[%s326_s10] sm:$0xff] %v547_v8 }
 0x45f   : > { %827 = shalt.err (!%p824_p8)
}
 0x460   : > { %676 = dma.vmem_to_hbm [thread:$0]  (%p960_p5), %s563_s12, 128, %s565_s13, %s550_s18  }
 0x461 PF: > { %p693_p9 = scmp.ge.s32.totalorder %s870_s30, 2  ;;  %s576_s20 = sand.u32 1, %s858_s27  }
 0x462   : > { %s577_s25 = scalar_lea.sflag [#allocation5], %s576_s20 }
 0x463   : > { %p686_p10 = pnand %p693_p9, %p964_p6 }
 0x465   : > { %p687_p11 = pneg %p686_p10 }
 0x467   : > { %853 = dma.done.wait (%p687_p11), %s577_s25, 128  }
 0x468   : > { %855 = vsyncadd (%p687_p11), %s577_s25, 4294967168  ;;  %p20_p12 = scmp.ge.s32.totalorder %s947_s11, 4   ;;  %s1087_s27 = smov %s862_s28 }
 0x469   : > { %s1088_s28 = smov %s866_s29  ;;  %s1089_s29 = smov %s958_s14 }
 0x46a   : > { %s1090_s30 = smov %s947_s11  ;;  %22 = sbr.rel (!%p20_p12) target bundleno = 5 (0x5), region = 96 }
 0x46f   :  { %583 = vsyncpa [#allocation4], 1 }
 0x470   :  { %585 = vsyncpa [#allocation4 + $0x1], 1 }
 0x471   :  { %586 = vsyncpa [#allocation7], 1 }
 0x472   :  { %587 = vsyncpa [#allocation5], 1 }
 0x473   :  { %589 = vsyncpa [#allocation5 + $0x1], 1 }

</bundles_post_ra>
